<compile_context>
chip_gen: v7x
topology: tpu7x:2x2x1
jax: 0.10.0
libtpu: 0.0.40
codegen_flags: <defaults>
</compile_context>

<pallas_src>
import math

import jax
import jax.numpy as jnp
from jax.experimental import pallas as pl
from jax.experimental.pallas import tpu as pltpu


def _round_up(x, m):
    return ((x + m - 1) // m) * m


def _vmem_capacity_bytes():
    try:
        return int(pltpu.get_tpu_info().vmem_capacity_bytes)
    except Exception:
        return 64 * 1024 * 1024          # conservative: v7x per-TensorCore VMEM


def _default_block_tokens():
    # v5e MXU is 4x128^2 -> 128-row tiles; v6e/v7x MXU is 2x256^2 -> 256-row tiles.
    try:
        kind = jax.devices()[0].device_kind.lower()
    except Exception:
        kind = ""
    return 128 if "v5" in kind else 256


# --------------------------------------------------------------------------- #
# Kernels
# --------------------------------------------------------------------------- #
def _onehot_gather_kernel(ids_ref, scale_ref, w_ref, o_ref):
    # ids_ref:   (TT, 1) int32   this block's token ids (blocked VMEM input)
    # scale_ref: (1, V)  float32 per-row dropout scale, VMEM-resident (const index)
    # w_ref:     (V, D)  table   raw embedding table, VMEM-resident (const index)
    # o_ref:     (TT, D) output block
    tt = o_ref.shape[0]
    v = w_ref.shape[0]
    ids = ids_ref[...]                                              # (TT, 1)
    onehot = (jax.lax.broadcasted_iota(jnp.int32, (tt, v), 1) == ids)
    onehot_f = onehot.astype(jnp.float32)                           # (TT, V)
    # Per-token scale: single nonzero per row -> exact (VPU mul + lane reduce).
    tok_scale = jnp.sum(onehot_f * scale_ref[...], axis=-1, keepdims=True)  # (TT,1)
    # MXU one-hot gather with f32 accumulation (exact row selection).
    gathered = jnp.dot(onehot_f.astype(w_ref.dtype), w_ref[...],
                       preferred_element_type=jnp.float32)          # (TT, D)
    o_ref[...] = (gathered * tok_scale).astype(o_ref.dtype)


def _rowcopy_gather_kernel(ids_sm_ref, w_ref, tscale_ref, o_ref, w_scr):
    # ids_sm_ref: (T_pad,) int32 in SMEM (scalar prefetch; used for row addressing)
    # w_ref:      (V, D) raw table, VMEM-resident (const index)
    # tscale_ref: (TT, 1) f32 per-token scale for this block (pre-gathered)
    # o_ref:      (TT, D) output block
    # w_scr:      (G, D) VMEM staging scratch (G = sublane multiple of table dtype)
    i = pl.program_id(0)
    tt = o_ref.shape[0]
    g_rows = w_scr.shape[0]
    base = i * tt

    @pl.loop(0, tt // g_rows)
    def _(g):
        start = pl.multiple_of(g * g_rows, g_rows)
        # Stage G rows into scratch, then emit one full sublane-aligned slab store.
        for jj in range(g_rows):
            row = ids_sm_ref[base + start + jj]
            w_scr[pl.ds(jj, 1), :] = w_ref[pl.ds(row, 1), :]
        o_ref[pl.ds(start, g_rows), :] = (
            w_scr[...].astype(jnp.float32) * tscale_ref[pl.ds(start, g_rows), :]
        ).astype(o_ref.dtype)


# --------------------------------------------------------------------------- #
# Wrapper
# --------------------------------------------------------------------------- #
def fraternal_embedding_lookup(ids, table, row_scale=None, *,
                               block_tokens=None, gather_impl=None,
                               onehot_vocab_limit=4096):
    """out[..., :] = (row_scale * table)[ids[...], :] with the scale fused in-kernel."""
    V, D = table.shape
    orig_shape = ids.shape
    T = math.prod(orig_shape)
    itemsize = table.dtype.itemsize

    if row_scale is None:
        row_scale = jnp.ones((V,), jnp.float32)
    row_scale = row_scale.reshape(V).astype(jnp.float32)

    # dtype-aware tiling: sublane multiple 8 (f32) / 16 (bf16) / 32 (int8),
    # lane-dense output (D padded to a multiple of 128).
    sub = max(8, 32 // itemsize)
    if block_tokens is None:
        block_tokens = _default_block_tokens()
    TT = _round_up(min(block_tokens, _round_up(T, sub)), sub)
    T_pad = _round_up(T, TT)
    n_blocks = T_pad // TT

    D_pad = _round_up(D, 128)
    table_p = table if D_pad == D else jnp.pad(table, ((0, 0), (0, D_pad - D)))

    # Clamp ids (VMEM has no runtime OOB check; OOB reads would silently alias).
    ids_flat = jnp.clip(ids.reshape(T).astype(jnp.int32), 0, V - 1)
    ids_flat = jnp.pad(ids_flat, (0, T_pad - T))

    if gather_impl is None:
        gather_impl = "onehot" if V <= onehot_vocab_limit else "rows"

    # Generation-aware VMEM budget (v7x: 64 MiB / TensorCore).
    vmem_cap = _vmem_capacity_bytes()
    budget = vmem_cap - (8 << 20)
    table_buf = 2 * V * D_pad * itemsize                 # resident table (assume 2x-buffered)
    out_buf = 2 * TT * D_pad * itemsize                  # double-buffered output block
    ids_buf = 2 * TT * 128 * 4                           # (TT,1) int32 block, lane-padded
    if gather_impl == "onehot":
        misc = TT * _round_up(V, 128) * 4 + 2 * 8 * _round_up(V, 128) * 4
    else:
        misc = sub * D_pad * itemsize + 2 * TT * 128 * 4
    need = table_buf + out_buf + ids_buf + misc + (2 << 20)
    if need > budget:
        # TODO(synk): HBM-resident table + per-row async-copy gather (double-buffered
        # VMEM staging slab) for tables that do not fit the per-core VMEM budget.
        raise NotImplementedError(
            "embedding table too large for the VMEM-resident gather path")
    vmem_limit = int(min(budget, max(need + (2 << 20), 32 << 20)))

    compiler_params = pltpu.CompilerParams(
        dimension_semantics=("parallel",),    # token blocks are independent
        vmem_limit_bytes=vmem_limit,
    )
    out_shape = jax.ShapeDtypeStruct((T_pad, D_pad), table.dtype)

    if gather_impl == "onehot":
        out = pl.pallas_call(
            _onehot_gather_kernel,
            out_shape=out_shape,
            grid_spec=pltpu.PrefetchScalarGridSpec(
                num_scalar_prefetch=0,
                grid=(n_blocks,),
                in_specs=[
                    pl.BlockSpec((TT, 1), lambda i: (i, 0)),       # ids block
                    pl.BlockSpec((1, V), lambda i: (0, 0)),        # row scale (resident)
                    pl.BlockSpec((V, D_pad), lambda i: (0, 0)),    # table (resident)
                ],
                out_specs=pl.BlockSpec((TT, D_pad), lambda i: (i, 0)),
            ),
            compiler_params=compiler_params,
        )(ids_flat.reshape(T_pad, 1), row_scale.reshape(1, V), table_p)
    else:
        # Per-token scale pre-gathered (T elements, negligible vs. the V*D table).
        tok_scale = row_scale[ids_flat].reshape(T_pad, 1)
        out = pl.pallas_call(
            _rowcopy_gather_kernel,
            out_shape=out_shape,
            grid_spec=pltpu.PrefetchScalarGridSpec(
                num_scalar_prefetch=1,                              # ids -> SMEM (addresses)
                grid=(n_blocks,),
                in_specs=[
                    pl.BlockSpec((V, D_pad), lambda i, ids_sm: (0, 0)),   # table (resident)
                    pl.BlockSpec((TT, 1), lambda i, ids_sm: (i, 0)),      # token scales
                ],
                out_specs=pl.BlockSpec((TT, D_pad), lambda i, ids_sm: (i, 0)),
                scratch_shapes=[pltpu.VMEM((sub, D_pad), table.dtype)],
            ),
            compiler_params=compiler_params,
        )(ids_flat, table_p, tok_scale)

    out = out[:T, :D]
    return out.reshape(orig_shape + (D,))


# --------------------------------------------------------------------------- #
# Module port
# --------------------------------------------------------------------------- #
class FraternalEmbeddedDropout:
    """JAX/Pallas port of the PyTorch FraternalEmbeddedDropout module.

    Instead of materializing a masked copy of the table (the PyTorch `_setweights`
    path rewrites the whole V x D weight), only a (V,)-sized row scale is cached
    and fused into the gather kernel.
    """

    def __init__(self, weight_raw, dropout=0.5):
        self.weight_raw = weight_raw        # (V, D) "weight_raw" parameter
        self.dropout = dropout
        self.training = True
        self._row_scale = None              # mirrors the cached `self.e.weight`

    def __call__(self, draw_mask, ids, *, rng=None):
        V, _ = self.weight_raw.shape

        if not self.training:
            # eval: _setweights() sets weight = raw  =>  scale of ones
            self._row_scale = jnp.ones((V,), jnp.float32)
        elif draw_mask:
            if rng is None:
                raise ValueError("rng key required when draw_mask=True in training")
            keep = 1.0 - self.dropout
            bern = jax.random.bernoulli(rng, p=keep, shape=(V, 1))
            self._row_scale = (bern.astype(jnp.float32) / keep).reshape(V)
        elif self._row_scale is None:
            raise RuntimeError(
                "draw_mask=False on the first training call: no embedded-dropout "
                "mask has been drawn yet (the PyTorch module would also fail here "
                "because `self.e.weight` was never set).")

        return fraternal_embedding_lookup(ids, self.weight_raw, self._row_scale)


# --------------------------------------------------------------------------- #
# Self-test
# --------------------------------------------------------------------------- #
if __name__ == "__main__":
    key = jax.random.PRNGKey(0)
    k_w, k_ids, k_mask = jax.random.split(key, 3)

    V, D = 32, 128        # vocab size, embedding dim (lane-dense last axis)
    B, S = 2, 9           # batch, sequence length (T=18 exercises token padding)
    dropout_p = 0.5

    weight_raw = jax.random.normal(k_w, (V, D), dtype=jnp.float32)
    ids = jax.random.randint(k_ids, (B, S), 0, V, dtype=jnp.int32)

    module = FraternalEmbeddedDropout(weight_raw, dropout=dropout_p)

    # training forward with a freshly drawn mask (one-hot MXU path)
    out_train = jax.block_until_ready(module(True, ids, rng=k_mask))
    ref_train = (weight_raw * module._row_scale.reshape(V, 1))[ids]   # plain-JAX reference
    assert out_train.shape == (B, S, D)
    assert jnp.allclose(out_train, ref_train, atol=1e-5, rtol=1e-5)

    # training forward reusing the previous mask (draw_mask=False)
    out_reuse = jax.block_until_ready(module(False, ids))
    assert jnp.allclose(out_reuse, ref_train, atol=1e-5, rtol=1e-5)

    # multi-block grid, one-hot path
    out_blocked = jax.block_until_ready(
        fraternal_embedding_lookup(ids, weight_raw, module._row_scale,
                                   block_tokens=8, gather_impl="onehot"))
    assert jnp.allclose(out_blocked, ref_train, atol=1e-5, rtol=1e-5)

    # multi-block grid, staged row-copy fallback path (exact copies + VPU scale)
    out_rows = jax.block_until_ready(
        fraternal_embedding_lookup(ids, weight_raw, module._row_scale,
                                   block_tokens=8, gather_impl="rows"))
    assert jnp.allclose(out_rows, ref_train, atol=1e-5, rtol=1e-5)

    # bf16 table: dtype-aware sublane rounding (TT multiple of 16) + bf16 MXU gather
    weight_bf16 = weight_raw.astype(jnp.bfloat16)
    out_bf16 = jax.block_until_ready(
        fraternal_embedding_lookup(ids, weight_bf16, module._row_scale))
    ref_bf16 = (weight_bf16.astype(jnp.float32)
                * module._row_scale.reshape(V, 1))[ids].astype(jnp.bfloat16)
    assert jnp.allclose(out_bf16.astype(jnp.float32), ref_bf16.astype(jnp.float32),
                        atol=2e-2, rtol=2e-2)

    # eval forward: raw weights, no mask
    module.training = False
    out_eval = jax.block_until_ready(module(False, ids))
    assert jnp.allclose(out_eval, weight_raw[ids], atol=1e-5, rtol=1e-5)

    print("KERNEL_OK")
</pallas_src>

<mosaic_0001>
module attributes {stable_mosaic.version = 11 : i64} {
  func.func @_onehot_gather_kernel(%arg0: i32, %arg1: memref<24x1xi32, #tpu.memory_space<vmem>>, %arg2: memref<1x32xf32, #tpu.memory_space<vmem>>, %arg3: memref<32x128xf32, #tpu.memory_space<vmem>>, %arg4: memref<24x128xf32, #tpu.memory_space<vmem>>) attributes {dimension_semantics = [#tpu.dimension_semantics<parallel>], iteration_bounds = array<i64: 1>, scalar_prefetch = 0 : i64, scratch_operands = 0 : i64, tpu.core_type = #tpu.core_type<tc>, window_params = [{transform_indices = @transform_0, window_bounds = array<i64: 24, 1>}, {pipeline_mode = #tpu.pipeline_mode<synchronous>, transform_indices = @transform_1, window_bounds = array<i64: 1, 32>}, {pipeline_mode = #tpu.pipeline_mode<synchronous>, transform_indices = @transform_2, window_bounds = array<i64: 32, 128>}, {transform_indices = @transform_3, window_bounds = array<i64: 24, 128>}]} {
    %c0 = arith.constant 0 : index
    %c0_0 = arith.constant 0 : index
    %0 = vector.load %arg1[%c0, %c0_0] : memref<24x1xi32, #tpu.memory_space<vmem>>, vector<24x1xi32>
    %1 = tpu.iota {dimensions = array<i32: 1>} : vector<24x32xi32>
    %2 = vector.broadcast %0 : vector<24x1xi32> to vector<24x32xi32>
    %3 = arith.cmpi eq, %1, %2 : vector<24x32xi32>
    %4 = arith.extui %3 : vector<24x32xi1> to vector<24x32xi32>
    %5 = arith.sitofp %4 : vector<24x32xi32> to vector<24x32xf32>
    %c0_1 = arith.constant 0 : index
    %c0_2 = arith.constant 0 : index
    %6 = vector.load %arg2[%c0_1, %c0_2] : memref<1x32xf32, #tpu.memory_space<vmem>>, vector<1x32xf32>
    %7 = vector.broadcast %6 : vector<1x32xf32> to vector<24x32xf32>
    %8 = arith.mulf %5, %7 : vector<24x32xf32>
    %cst = arith.constant dense<0.000000e+00> : vector<24xf32>
    %9 = vector.multi_reduction <add>, %8, %cst [1] : vector<24x32xf32> to vector<24xf32>
    %10 = vector.shape_cast %9 : vector<24xf32> to vector<24x1xf32>
    %c0_3 = arith.constant 0 : index
    %c0_4 = arith.constant 0 : index
    %11 = vector.load %arg3[%c0_3, %c0_4] : memref<32x128xf32, #tpu.memory_space<vmem>>, vector<32x128xf32>
    %cst_5 = arith.constant dense<0.000000e+00> : vector<24x128xf32>
    %12 = tpu.matmul %5, %11, %cst_5 {dimension_numbers = #tpu.dot_dimension_numbers<[1], [0], [0], [1], [0, 0, 1, 1], [], []>} : vector<24x32xf32>, vector<32x128xf32>, vector<24x128xf32> -> vector<24x128xf32>
    %13 = vector.broadcast %10 : vector<24x1xf32> to vector<24x128xf32>
    %14 = arith.mulf %12, %13 : vector<24x128xf32>
    %c0_6 = arith.constant 0 : index
    %c0_7 = arith.constant 0 : index
    %15 = vector.load %arg4[%c0_6, %c0_7] : memref<24x128xf32, #tpu.memory_space<vmem>>, vector<24x128xf32>
    tpu.vector_store %arg4[%c0_6, %c0_7], %14 {strides = array<i32>} : memref<24x128xf32, #tpu.memory_space<vmem>>, vector<24x128xf32>,
    return
  }
  func.func @transform_0(%arg0: i32) -> (i32, i32) {
    %c0_i32 = arith.constant 0 : i32
    %c0_i32_0 = arith.constant 0 : i32
    return %arg0, %c0_i32 : i32, i32
  }
  func.func @transform_1(%arg0: i32) -> (i32, i32) {
    %c0_i32 = arith.constant 0 : i32
    %c0_i32_0 = arith.constant 0 : i32
    %c0_i32_1 = arith.constant 0 : i32
    return %c0_i32, %c0_i32_0 : i32, i32
  }
  func.func @transform_2(%arg0: i32) -> (i32, i32) {
    %c0_i32 = arith.constant 0 : i32
    %c0_i32_0 = arith.constant 0 : i32
    %c0_i32_1 = arith.constant 0 : i32
    return %c0_i32, %c0_i32_0 : i32, i32
  }
  func.func @transform_3(%arg0: i32) -> (i32, i32) {
    %c0_i32 = arith.constant 0 : i32
    %c0_i32_0 = arith.constant 0 : i32
    return %arg0, %c0_i32 : i32, i32
  }
}

</mosaic_0001>

<bundles_post_ra>
// kernel: tpu_custom_call.1
= control target key start
LH: loop header
LB: loop body
LE: loop exit
PB: predicated region body
PF: predicated region fallthrough
CT: control target
= control target key end

     0   :  { %8 = vsyncpa [#allocation3], 0  ;;  %s367_s0 = inlined_call_operand.vmem [shape: s32[24,1], index: 0, kind: input, shape index: {}]   ;;  %s368_s1 = inlined_call_operand.hbm [shape: f32[1,32], index: 1, kind: input, shape index: {}]   ;;  %s369_s2 = inlined_call_operand.vmem [shape: f32[32,128], index: 2, kind: input, shape index: {}]   ;;  %s370_s3 = inlined_call_operand.hbm [shape: f32[24,128], index: 3, kind: output, shape index: {}]  }
   0x1   :  { %9 = vsyncpa [#allocation4], 0  ;;  %s285_s12 = smov [#allocation2]   ;;  %s237_s16 = scalar_lea.hbm %s368_s1, 16 }
   0x2   :  { %s18_s13 = sshll.u32 %s285_s12, 4  ;;  %p238_p0 = scmp.ne.s32.totalorder %s368_s1, %s237_s16  ;;  %s19_s13 = int_to_ptr.vmem [resolvable:$true] %s18_s13 }
   0x3   :  { %p241_p1 = scmp.lt.u32.totalorder %s237_s16, %s368_s1 }
   0x5   :  { %p243_p2 = pnand %p241_p1, %p238_p0 }
   0x7   :  { %246 = shalt.err (!%p243_p2)
}
   0x8   :  { %s247_s21 = scalar_lea.vmem %s19_s13, 16  ;;  %s251_s22 = scalar_lea.vmem %s19_s13, 32 }
   0x9   :  { %p248_p3 = scmp.ne.s32.totalorder %s19_s13, %s247_s21  ;;  %p252_p4 = scmp.lt.s32.totalorder %s19_s13, %s19_s13 }
   0xa   :  { %p253_p5 = scmp.lt.s32.totalorder %s251_s22, %s247_s21 }
   0xc   :  { %p254_p6 = por %p253_p5, %p252_p4 }
   0xe   :  { %p255_p7 = pnand %p254_p6, %p248_p3 }
  0x10   :  { %258 = shalt.err (!%p255_p7)
}
  0x11   :  { %21 = dma.hbm_to_vmem [thread:$0]  %s368_s1, 16, %s19_s13, [#allocation3]  }
  0x12   :  { %281 = dma.done.wait [#allocation3], 16  }
  0x13   :  { %282 = vsyncadd [#allocation3], 4294967280  ;;  %v286_v0 = vmov 0   ;;  %v287_v1 = vmov 0.0|0.0   ;;  %v28_v2 = vld [vmem:[%s367_s0 + $0x8] sm:$0xff]  ;;  %v29_v3 = vld [vmem:[%s367_s0 + $0x10] sm:$0xff]  ;;  %v30_v12 = vlaneseq }
  0x14   :  { %235 = vset.pattern.permute.xlu0 %v286_v0  ;;  %236 = vset.pattern.permute.xlu1 %v286_v0  ;;  %v70_v4 = vld [vmem:[%s369_s2] sm:$0xff]  ;;  %v71_v5 = vld [vmem:[%s369_s2 + $0x8] sm:$0xff]  ;;  %v72_v6 = vld [vmem:[%s369_s2 + $0x10] sm:$0xff]  ;;  %vm288_vm0 = vmmov 0   ;;  %v289_v10 = vmov 0.0   ;;  %vm60_vm1 = vcmask 261120  }
  0x15   :  { %223 = vmatprep.subr.bf16.mxu1 %v287_v1  ;;  %217 = vmatprep.subr.bf16.mxu0 %v287_v1  ;;  %v27_v7 = vld [vmem:[%s367_s0] sm:$0xff]  ;;  %v218_v8 = vpack.c.bf16 %v71_v5, %v70_v4  ;;  %v73_v9 = vld [vmem:[%s369_s2 + $0x18] sm:$0xff]  ;;  %v31_v13 = vand.u32 127, %v30_v12  ;;  %s290_s0 = smov [#allocation5]  }
  0x16   :  { %36 = vperm.xlu0 %235, %v28_v2   ;;  %39 = vperm.xlu1 %236, %v29_v3   ;;  %v221_v11 = vpack.c.bf16 %v73_v9, %v72_v6  ;;  %v189_v16 = vld [vmem:[#allocation2] ss:$0 sm:$0xff]  ;;  %s174_s2 = sshll.u32 %s290_s0, 4  ;;  %s175_s2 = int_to_ptr.vmem [resolvable:$true] %s174_s2 }
  0x17   :  { %211 = vmatprep.mubr.msk.f32.mxu1 %vm288_vm0, %v289_v10  ;;  %208 = vmatprep.mubr.msk.f32.mxu0 %vm288_vm0, %v289_v10  ;;  %s259_s11 = scalar_lea.vmem %s175_s2, 384  ;;  %p264_p9 = scmp.lt.s32.totalorder %s175_s2, %s175_s2 }
  0x18   :  { %225 = vmatpush3.bf16.msra.mxu1 %v218_v8  ;;  %219 = vmatpush3.bf16.msra.mxu0 %v218_v8  ;;  %p260_p8 = scmp.ne.s32.totalorder %s175_s2, %s259_s11  ;;  %p265_p10 = scmp.lt.s32.totalorder %s259_s11, %s259_s11 }
  0x19   :  { %224 = vmatprep.subr.bf16.mxu1 %v287_v1  ;;  %220 = vmatprep.subr.bf16.mxu0 %v287_v1 }
  0x1a   :  { %33 = vperm.xlu0 %235, %v27_v7   ;;  %p266_p11 = por %p265_p10, %p264_p9 }
  0x1c   :  { %226 = vmatpush3.bf16.msra.mxu1 %v221_v11  ;;  %222 = vmatpush3.bf16.msra.mxu0 %v221_v11  ;;  %p267_p12 = pnand %p266_p11, %p260_p8 }
  0x95   :  { %v37_v14 = vpop.permute.xlu0 %36  ;;  %v40_v15 = vpop.permute.xlu1 %39 }
  0x96   :  { %vm42_vm2 = vcmp.eq.s32.totalorder %v31_v13, %v37_v14  ;;  %vm43_vm3 = vcmp.eq.s32.totalorder %v31_v13, %v40_v15 }
  0x97   :  { %v187_v17 = vsel %vm42_vm2, 1.0, %v289_v10  ;;  %v188_v18 = vsel %vm43_vm3, 1.0, %v289_v10 }
  0x98   :  { %212 = vmatmul.mubr.msk.f32.vlgmr.msra.gmra.mrb[0].mxu1 %vm60_vm1, %v187_v17  ;;  %v58_v19 = vmul.f32 %v189_v16, %v187_v17  ;;  %v59_v20 = vmul.f32 %v189_v16, %v188_v18 }
  0x99   :  { %v34_v21 = vpop.permute.xlu0 %33  ;;  %214 = vmatprep.mubr.msk.f32.mxu1 %vm288_vm0, %v289_v10 }
  0x9a   :  { %vm41_vm4 = vcmp.eq.s32.totalorder %v31_v13, %v34_v21  ;;  %v64_v22 = vsel %vm60_vm1, %v58_v19, 0.0  ;;  %v67_v24 = vsel %vm60_vm1, %v59_v20, 0.0 }
  0x9b   :  { %v186_v23 = vsel %vm41_vm4, 1.0, %v289_v10  ;;  %65 = vadd.xlane.f32.xlu0 %v64_v22 }
  0x9c   :  { %209 = vmatmul.mubr.msk.f32.vlgmr.msra.gmra.mrb[0].mxu0 %vm60_vm1, %v186_v23  ;;  %215 = vmatmul.mubr.msk.f32.gmra.mrb[2].mxu1 %vm60_vm1, %v188_v18  ;;  %v57_v25 = vmul.f32 %v189_v16, %v186_v23 }
  0x9e   :  { %v61_v26 = vsel %vm60_vm1, %v57_v25, 0.0 }
  0x9f   :  { %68 = vadd.xlane.f32.xlu0 %v67_v24  ;;  %62 = vadd.xlane.f32.xlu1 %v61_v26 }
 0x128   :  { %v66_v27 = vpop.xlane.xlu0 %65 }
 0x12c   :  { %v63_v31 = vpop.xlane.xlu1 %62  ;;  %v69_v32 = vpop.xlane.xlu0 %68 }
 0x16b   :  { %v154_v28 = vpop.f32.mrb[0].mxu1 }
 0x16c   :  { %v164_v29 = vmul.f32 %v154_v28, %v66_v27  ;;  %v213_v30 = vpop.f32.mrb[1].mxu1 }
 0x16e   :  { %167 = vst [vmem:[#allocation5 + $0x8] sm:$0xff] %v164_v29 }
 0x16f   :  { %v149_v33 = vpop.f32.mrb[0].mxu0  ;;  %v159_v34 = vpop.f32.mrb[2].mxu1 }
 0x170   :  { %v163_v35 = vmul.f32 %v149_v33, %v63_v31  ;;  %v165_v36 = vmul.f32 %v159_v34, %v69_v32  ;;  %v210_v37 = vpop.f32.mrb[1].mxu0  ;;  %v216_v38 = vpop.f32.mrb[3].mxu1 }
 0x172   :  { %166 = vst [vmem:[#allocation5] sm:$0xff] %v163_v35  ;;  %168 = vst [vmem:[#allocation5 + $0x10] sm:$0xff] %v165_v36 }
 0x173   :  { %270 = shalt.err (!%p267_p12)
}
 0x174   :  { %s271_s14 = scalar_lea.hbm %s370_s3, 384 }
 0x175   :  { %p272_p13 = scmp.ne.s32.totalorder %s370_s3, %s271_s14  ;;  %p275_p0 = scmp.lt.u32.totalorder %s271_s14, %s370_s3 }
 0x177   :  { %p277_p1 = pnand %p275_p0, %p272_p13 }
 0x179   :  { %280 = shalt.err (!%p277_p1)
}
 0x17a   :  { %s291_s19 = smov 128   ;;  %s292_s20 = smov 8  }
 0x17b   :  { %180 = dma.vmem_to_hbm [thread:$0]  %s175_s2, 384, %s370_s3, [#allocation4], %s291_s19, %s291_s19, %s292_s20  }
 0x17c   :  { %283 = dma.done.wait [#allocation4], 384  }
 0x17d   :  { %284 = vsyncadd [#allocation4], 4294966912 }
 0x17e   :  { %184 = vsyncpa [#allocation3], 1 }
 0x17f   :  { %185 = vsyncpa [#allocation4], 1 }

</bundles_post_ra>
